<compile_context>
chip_gen: v5e
topology: v5e:2x2
jax: 0.10.0
libtpu: 0.0.40
codegen_flags: <defaults>
</compile_context>

<pallas_src>
import functools

import jax
import jax.numpy as jnp
from jax import lax
from jax.experimental import pallas as pl
from jax.experimental.pallas import tpu as pltpu

_VMEM_LIMIT = 48 * 1024 * 1024      # headroom under v7x's 64 MiB physical VMEM
_XP_RESIDENT_BYTES = 16 * 1024 * 1024  # double-buffered xp budget (all chips)


def _round_up(x, m):
    return (x + m - 1) // m * m


def _pick_tm(n_pad):
    # Prefer large target tiles but keep >= 2 tiles so v7x's 2nd TC has work.
    for c in (1024, 512, 256, 128):
        if n_pad % c == 0 and n_pad // c >= 2:
            return c
    return n_pad


def _pick_tn(n_pad):
    for c in (2048, 1024, 512, 256, 128):
        if n_pad % c == 0:
            return c
    return n_pad


def _alpha_mat(a, out_per_head, d_pad):
    """Block-structured [d_pad, H] matrix so (xp @ mat)[n, h] = a[h] . xp_h[n]."""
    heads = a.shape[0]
    m = jnp.zeros((d_pad, heads), jnp.float32)
    for h in range(heads):
        m = m.at[h * out_per_head:(h + 1) * out_per_head, h].set(a[h])
    return m


# ---------------------------------------------------------------------------
# Stage 1: projection + attention-score terms (tiled over node rows)
# ---------------------------------------------------------------------------
def _gat_proj_kernel(x_ref, w_ref, asrc_ref, adst_ref,
                     xp_ref, adst_out_ref, asrcT_out_ref):
    xp = jnp.dot(x_ref[...], w_ref[...],
                 preferred_element_type=jnp.float32)          # [TM, Dp] f32

    # Per-head score terms as matmuls (no per-head XLU reductions).
    a_dst = jnp.dot(xp, adst_ref[...],
                    preferred_element_type=jnp.float32)       # [TM, H]
    # Source term already lane-major ([H, TM]): contract lhs dim 0 vs xp dim 1.
    a_srcT = lax.dot_general(asrc_ref[...], xp,
                             (((0,), (1,)), ((), ())),
                             preferred_element_type=jnp.float32)  # [H, TM]

    xp_ref[...] = xp.astype(jnp.bfloat16)
    adst_out_ref[...] = a_dst
    asrcT_out_ref[...] = a_srcT


# ---------------------------------------------------------------------------
# Stage 2: masked attention with online softmax (grid = (target, source_step))
# ---------------------------------------------------------------------------
def _gat_attn_kernel(cols_ref, cnt_ref, adj_ref, adst_ref, asrcT_ref, xp_ref,
                     bias_ref, out_ref, m_ref, l_ref, acc_ref, *,
                     heads, out_per_head, concat, apply_elu,
                     tn, grid_j, xp_resident):
    i = pl.program_id(0)
    s = pl.program_id(1)
    ns = pl.num_programs(1)
    c = out_per_head
    neg = jnp.float32(-1e30)   # finite sentinel (self-loops guarantee every row
                               # eventually sees a real edge, so no NaN/garbage)

    @pl.when(s == 0)
    def _init():
        m_ref[...] = jnp.full(m_ref.shape, neg, jnp.float32)
        l_ref[...] = jnp.zeros(l_ref.shape, jnp.float32)
        acc_ref[...] = jnp.zeros(acc_ref.shape, jnp.float32)
        out_ref[...] = jnp.zeros(out_ref.shape, out_ref.dtype)  # pad lanes stay 0

    # Skip fully-masked source blocks entirely (padded table entries repeat the
    # last valid block index, so their DMA is also elided by the pipeline).
    @pl.when(s < cnt_ref[i])
    def _compute():
        # Mask hoisted out of the per-head loop: one compare+select per tile.
        neg_bias = jnp.where(adj_ref[...] > 0, jnp.float32(0.0), neg)  # [TM,TN]
        adst = adst_ref[...]                                           # [TM,H]
        asrcT = asrcT_ref[...]                                         # [H,TN]
        if xp_resident:
            col0 = pl.multiple_of(cols_ref[i * grid_j + s] * tn, tn)
            xp = xp_ref[pl.ds(col0, tn), :]                            # [TN,Dp]
        else:
            xp = xp_ref[...]                                           # [TN,Dp]

        tm_rows = neg_bias.shape[0]
        pv_parts = []
        scale_parts = []
        for h in range(heads):
            e = adst[:, h:h + 1] + asrcT[h:h + 1, :]                   # [TM,TN]
            e = jnp.maximum(e, 0.2 * e) + neg_bias                     # LeakyReLU+mask
            m_prev = m_ref[h]                                          # [TM,1]
            m_new = jnp.maximum(m_prev, jnp.max(e, axis=-1, keepdims=True))
            scale = jnp.exp(m_prev - m_new)                            # [TM,1]
            p = jnp.exp(e - m_new)                                     # [TM,TN]
            l_ref[h] = scale * l_ref[h] + jnp.sum(p, axis=-1, keepdims=True)
            m_ref[h] = m_new
            pv_parts.append(jnp.dot(p.astype(jnp.bfloat16),
                                    xp[:, h * c:(h + 1) * c],
                                    preferred_element_type=jnp.float32))
            scale_parts.append(jnp.broadcast_to(scale, (tm_rows, c)))
        pv_all = jnp.concatenate(pv_parts, axis=-1)                    # [TM,H*C]
        scale_all = jnp.concatenate(scale_parts, axis=-1)              # [TM,H*C]
        acc_ref[...] = scale_all * acc_ref[...] + pv_all               # one wide RMW

    @pl.when(s == ns - 1)
    def _finalize():
        bias = bias_ref[...]                                           # [1,d_out]
        tm_rows = acc_ref.shape[0]
        if concat:
            inv_all = jnp.concatenate(
                [jnp.broadcast_to(pl.reciprocal(l_ref[h], approx=True),
                                  (tm_rows, c)) for h in range(heads)],
                axis=-1)                                               # [TM,H*C]
            res = acc_ref[...] * inv_all + bias
        else:
            res = jnp.zeros((tm_rows, c), jnp.float32)
            for h in range(heads):
                res = res + acc_ref[:, h * c:(h + 1) * c] * pl.reciprocal(
                    l_ref[h], approx=True)
            res = res * jnp.float32(1.0 / heads) + bias
        if apply_elu:
            res = jnp.where(res > 0, res, jnp.expm1(res))              # ELU
        out_ref[:, :res.shape[-1]] = res.astype(out_ref.dtype)


# ---------------------------------------------------------------------------
# One GATConv layer (padded, lane-dense output kept padded between layers)
# ---------------------------------------------------------------------------
def gat_conv(x, adj, cols_flat, cnt, w, a_src, a_dst, bias, *, heads,
             out_per_head, concat, apply_elu, tm, tn, out_dtype):
    n_pad = adj.shape[0]
    f_x = x.shape[1]
    f_in = w.shape[0]
    assert f_x >= f_in
    c = out_per_head
    d_proj = heads * c
    d_proj_pad = _round_up(d_proj, 128)
    d_out = d_proj if concat else c
    d_out_pad = _round_up(d_out, 128)
    grid_i, grid_j = n_pad // tm, n_pad // tn

    # bf16 operands built in the wrapper (no per-grid-step in-kernel casts).
    x = x.astype(jnp.bfloat16)
    w_pad = jnp.zeros((f_x, d_proj_pad), jnp.bfloat16).at[:f_in, :d_proj].set(
        w.astype(jnp.bfloat16))
    asrc_mat = _alpha_mat(a_src, c, d_proj_pad)
    adst_mat = _alpha_mat(a_dst, c, d_proj_pad)

    # ---- Stage 1: projection + score terms (hoisted out of the N^2 loop) ----
    xp, adst, asrcT = pl.pallas_call(
        _gat_proj_kernel,
        grid=(grid_i,),
        in_specs=[
            pl.BlockSpec((tm, f_x), lambda i: (i, 0)),
            pl.BlockSpec((f_x, d_proj_pad), lambda i: (0, 0)),
            pl.BlockSpec((d_proj_pad, heads), lambda i: (0, 0)),
            pl.BlockSpec((d_proj_pad, heads), lambda i: (0, 0)),
        ],
        out_specs=(
            pl.BlockSpec((tm, d_proj_pad), lambda i: (i, 0)),
            pl.BlockSpec((tm, heads), lambda i: (i, 0)),
            pl.BlockSpec((heads, tm), lambda i: (0, i)),
        ),
        out_shape=(
            jax.ShapeDtypeStruct((n_pad, d_proj_pad), jnp.bfloat16),
            jax.ShapeDtypeStruct((n_pad, heads), jnp.float32),
            jax.ShapeDtypeStruct((heads, n_pad), jnp.float32),
        ),
        compiler_params=pltpu.CompilerParams(
            dimension_semantics=("parallel",),
            vmem_limit_bytes=_VMEM_LIMIT),
    )(x, w_pad, asrc_mat, adst_mat)

    # Keep xp fully VMEM-resident (single DMA per layer) when it fits a budget
    # that is safe on every generation (v7x has only 64 MiB physical VMEM).
    xp_resident = 2 * n_pad * d_proj_pad * 2 <= _XP_RESIDENT_BYTES
    if xp_resident:
        xp_spec = pl.BlockSpec((n_pad, d_proj_pad),
                               lambda i, s, cols, cnt: (0, 0))
    else:
        xp_spec = pl.BlockSpec((tn, d_proj_pad),
                               lambda i, s, cols, cnt: (cols[i * grid_j + s], 0))

    kernel = functools.partial(
        _gat_attn_kernel, heads=heads, out_per_head=c, concat=concat,
        apply_elu=apply_elu, tn=tn, grid_j=grid_j, xp_resident=xp_resident)

    cost = pl.CostEstimate(
        flops=int(2 * n_pad * n_pad * heads * (c + 3)),
        transcendentals=int(n_pad * n_pad * heads),
        bytes_accessed=int(n_pad * n_pad                        # adj (int8)
                           + n_pad * d_proj_pad * 2             # xp (bf16)
                           + n_pad * d_out_pad
                           * jnp.dtype(out_dtype).itemsize),    # output
    )

    out = pl.pallas_call(
        kernel,
        grid_spec=pltpu.PrefetchScalarGridSpec(
            num_scalar_prefetch=2,
            grid=(grid_i, grid_j),
            in_specs=[
                pl.BlockSpec((tm, tn),
                             lambda i, s, cols, cnt: (i, cols[i * grid_j + s])),
                pl.BlockSpec((tm, heads), lambda i, s, cols, cnt: (i, 0)),
                pl.BlockSpec((heads, tn),
                             lambda i, s, cols, cnt: (0, cols[i * grid_j + s])),
                xp_spec,
                pl.BlockSpec((1, d_out), lambda i, s, cols, cnt: (0, 0)),
            ],
            out_specs=pl.BlockSpec((tm, d_out_pad),
                                   lambda i, s, cols, cnt: (i, 0)),
            scratch_shapes=[
                pltpu.VMEM((heads, tm, 1), jnp.float32),   # running max m
                pltpu.VMEM((heads, tm, 1), jnp.float32),   # running denom l
                pltpu.VMEM((tm, d_proj), jnp.float32),     # accumulator (H*C)
            ],
        ),
        out_shape=jax.ShapeDtypeStruct((n_pad, d_out_pad), out_dtype),
        compiler_params=pltpu.CompilerParams(
            dimension_semantics=("parallel", "arbitrary"),
            vmem_limit_bytes=_VMEM_LIMIT),
        cost_estimate=cost,
    )(cols_flat, cnt, adj, adst, asrcT, xp, bias)
    # Rows and lanes stay padded between layers; caller slices at the very end.
    return out


def init_gat_params(key, num_features, hidden_channels, out_channels,
                    num_heads=1, num_layers=2):
    """Deterministic (glorot-ish) parameters mirroring the torch module's shapes."""
    dims = [(num_features, hidden_channels, True)]
    for _ in range(num_layers - 2):
        dims.append((hidden_channels * num_heads, hidden_channels, True))
    dims.append((hidden_channels * num_heads, out_channels, False))

    params = []
    for (f_in, f_out, concat) in dims:
        key, kw, ka1, ka2 = jax.random.split(key, 4)
        scale_w = (2.0 / (f_in + num_heads * f_out)) ** 0.5
        w = scale_w * jax.random.normal(kw, (f_in, num_heads * f_out), jnp.float32)
        scale_a = (2.0 / (f_out + 1)) ** 0.5
        a_src = scale_a * jax.random.normal(ka1, (num_heads, f_out), jnp.float32)
        a_dst = scale_a * jax.random.normal(ka2, (num_heads, f_out), jnp.float32)
        bias_dim = num_heads * f_out if concat else f_out
        bias = jnp.zeros((1, bias_dim), jnp.float32)      # PyG default: zeros
        params.append(dict(w=w, a_src=a_src, a_dst=a_dst, bias=bias,
                           f_out=f_out, concat=concat))
    return params


def build_adjacency(edge_index, num_nodes, n_pad):
    """Dense int8 mask adj[i, j] = 1 iff edge j -> i; self-loops added (PyG default).

    Padded to n_pad nodes (padded nodes get only self-loops); int8 halves the
    dominant O(N^2) HBM stream vs bf16.
    """
    src, dst = edge_index[0], edge_index[1]
    adj = jnp.zeros((n_pad, n_pad), jnp.int8)
    adj = adj.at[dst, src].set(jnp.int8(1))
    adj = jnp.maximum(adj, jnp.eye(n_pad, dtype=jnp.int8))
    # TODO(synk): PyG's edge-list softmax counts duplicate edges twice; the
    # binary mask dedups them (differs only on multigraphs).
    return adj


def _block_tables(adj, tm, tn):
    """Per target-row-tile list of non-empty source tiles (+ counts).

    Padded entries repeat the last valid block index so Pallas elides their
    DMA (same block index => no refetch); the kernel skips their compute.
    """
    n_pad = adj.shape[0]
    gi, gj = n_pad // tm, n_pad // tn
    occ = jnp.any(adj.reshape(gi, tm, gj, tn) != 0, axis=(1, 3))   # [gi, gj]
    cnt = jnp.sum(occ, axis=1).astype(jnp.int32)                   # >= 1 (self-loops)
    col = jnp.arange(gj, dtype=jnp.int32)
    keys = jnp.where(occ, col[None, :], col[None, :] + gj)
    cols = jnp.argsort(keys, axis=1).astype(jnp.int32)             # occupied first
    last = cols[jnp.arange(gi), jnp.maximum(cnt - 1, 0)]
    srange = jnp.arange(gj, dtype=jnp.int32)[None, :]
    cols = jnp.where(srange < cnt[:, None], cols, last[:, None])
    return cols.reshape(-1), cnt                                   # flat (SMEM-friendly)


def gat_forward(x, edge_index, params, num_heads, dropout=0.0):
    """Forward of GAT: all layers but last are concat + ELU; dropout p=0 -> no-op."""
    n = x.shape[0]
    n_pad = _round_up(max(n, 1), 128)
    adj = build_adjacency(edge_index, n, n_pad)

    tm = _pick_tm(n_pad)
    tn = _pick_tn(n_pad)
    cols_flat, cnt = _block_tables(adj, tm, tn)

    h = jnp.zeros((n_pad, x.shape[1]), jnp.bfloat16).at[:n, :].set(
        x.astype(jnp.bfloat16))
    for layer in params[:-1]:
        h = gat_conv(h, adj, cols_flat, cnt, layer["w"], layer["a_src"],
                     layer["a_dst"], layer["bias"], heads=num_heads,
                     out_per_head=layer["f_out"], concat=True, apply_elu=True,
                     tm=tm, tn=tn, out_dtype=jnp.bfloat16)
        # TODO(synk): dropout with p=0.0 (module default) is an identity.
    last = params[-1]
    h = gat_conv(h, adj, cols_flat, cnt, last["w"], last["a_src"],
                 last["a_dst"], last["bias"], heads=num_heads,
                 out_per_head=last["f_out"], concat=False, apply_elu=False,
                 tm=tm, tn=tn, out_dtype=jnp.float32)
    return h[:n, :last["f_out"]].astype(jnp.float32)


if __name__ == "__main__":
    # Small shapes consistent with the module's forward.
    N = 16            # number of graph nodes
    NUM_FEATURES = 8
    HIDDEN = 16
    OUT_CHANNELS = 4
    NUM_HEADS = 2
    NUM_LAYERS = 2
    E = 40            # number of directed edges

    key = jax.random.PRNGKey(0)
    k_x, k_src, k_dst, k_p = jax.random.split(key, 4)

    x = jax.random.normal(k_x, (N, NUM_FEATURES), jnp.float32)
    src = jax.random.randint(k_src, (E,), 0, N)
    dst = jax.random.randint(k_dst, (E,), 0, N)
    edge_index = jnp.stack([src, dst], axis=0)   # [2, E], row0=source, row1=target

    params = init_gat_params(k_p, NUM_FEATURES, HIDDEN, OUT_CHANNELS,
                             num_heads=NUM_HEADS, num_layers=NUM_LAYERS)

    out = gat_forward(x, edge_index, params, NUM_HEADS)
    out = jax.block_until_ready(out)
    assert out.shape == (N, OUT_CHANNELS), out.shape
    assert bool(jnp.all(jnp.isfinite(out)))
    print("KERNEL_OK")
</pallas_src>

<mosaic_0001>
module attributes {stable_mosaic.version = 11 : i64} {
  func.func @_gat_proj_kernel(%arg0: i32, %arg1: memref<128x8xbf16, #tpu.memory_space<vmem>>, %arg2: memref<8x128xbf16, #tpu.memory_space<vmem>>, %arg3: memref<128x2xf32, #tpu.memory_space<vmem>>, %arg4: memref<128x2xf32, #tpu.memory_space<vmem>>, %arg5: memref<128x128xbf16, #tpu.memory_space<vmem>>, %arg6: memref<128x2xf32, #tpu.memory_space<vmem>>, %arg7: memref<2x128xf32, #tpu.memory_space<vmem>>) attributes {dimension_semantics = [#tpu.dimension_semantics<parallel>], iteration_bounds = array<i64: 1>, scalar_prefetch = 0 : i64, scratch_operands = 0 : i64, tpu.core_type = #tpu.core_type<tc>, window_params = [{transform_indices = @transform_0, window_bounds = array<i64: 128, 8>}, {pipeline_mode = #tpu.pipeline_mode<synchronous>, transform_indices = @transform_1, window_bounds = array<i64: 8, 128>}, {pipeline_mode = #tpu.pipeline_mode<synchronous>, transform_indices = @transform_2, window_bounds = array<i64: 128, 2>}, {pipeline_mode = #tpu.pipeline_mode<synchronous>, transform_indices = @transform_3, window_bounds = array<i64: 128, 2>}, {transform_indices = @transform_4, window_bounds = array<i64: 128, 128>}, {transform_indices = @transform_5, window_bounds = array<i64: 128, 2>}, {transform_indices = @transform_6, window_bounds = array<i64: 2, 128>}]} {
    %c0 = arith.constant 0 : index
    %c0_0 = arith.constant 0 : index
    %0 = vector.load %arg1[%c0, %c0_0] : memref<128x8xbf16, #tpu.memory_space<vmem>>, vector<128x8xbf16>
    %c0_1 = arith.constant 0 : index
    %c0_2 = arith.constant 0 : index
    %1 = vector.load %arg2[%c0_1, %c0_2] : memref<8x128xbf16, #tpu.memory_space<vmem>>, vector<8x128xbf16>
    %cst = arith.constant dense<0.000000e+00> : vector<128x128xf32>
    %2 = tpu.matmul %0, %1, %cst {dimension_numbers = #tpu.dot_dimension_numbers<[1], [0], [0], [1], [0, 0, 1, 1], [], []>} : vector<128x8xbf16>, vector<8x128xbf16>, vector<128x128xf32> -> vector<128x128xf32>
    %c0_3 = arith.constant 0 : index
    %c0_4 = arith.constant 0 : index
    %3 = vector.load %arg4[%c0_3, %c0_4] : memref<128x2xf32, #tpu.memory_space<vmem>>, vector<128x2xf32>
    %cst_5 = arith.constant dense<0.000000e+00> : vector<128x2xf32>
    %4 = tpu.matmul %2, %3, %cst_5 {dimension_numbers = #tpu.dot_dimension_numbers<[1], [0], [0], [1], [0, 0, 1, 1], [], []>} : vector<128x128xf32>, vector<128x2xf32>, vector<128x2xf32> -> vector<128x2xf32>
    %c0_6 = arith.constant 0 : index
    %c0_7 = arith.constant 0 : index
    %5 = vector.load %arg3[%c0_6, %c0_7] : memref<128x2xf32, #tpu.memory_space<vmem>>, vector<128x2xf32>
    %cst_8 = arith.constant dense<0.000000e+00> : vector<2x128xf32>
    %6 = tpu.matmul %5, %2, %cst_8 {dimension_numbers = #tpu.dot_dimension_numbers<[0], [1], [1], [0], [0, 1, 1, 0], [], []>} : vector<128x2xf32>, vector<128x128xf32>, vector<2x128xf32> -> vector<2x128xf32>
    %7 = arith.truncf %2 : vector<128x128xf32> to vector<128x128xbf16>
    %c0_9 = arith.constant 0 : index
    %c0_10 = arith.constant 0 : index
    %8 = vector.load %arg5[%c0_9, %c0_10] : memref<128x128xbf16, #tpu.memory_space<vmem>>, vector<128x128xbf16>
    tpu.vector_store %arg5[%c0_9, %c0_10], %7 {strides = array<i32>} : memref<128x128xbf16, #tpu.memory_space<vmem>>, vector<128x128xbf16>,
    %c0_11 = arith.constant 0 : index
    %c0_12 = arith.constant 0 : index
    %9 = vector.load %arg6[%c0_11, %c0_12] : memref<128x2xf32, #tpu.memory_space<vmem>>, vector<128x2xf32>
    tpu.vector_store %arg6[%c0_11, %c0_12], %4 {strides = array<i32>} : memref<128x2xf32, #tpu.memory_space<vmem>>, vector<128x2xf32>,
    %c0_13 = arith.constant 0 : index
    %c0_14 = arith.constant 0 : index
    %10 = vector.load %arg7[%c0_13, %c0_14] : memref<2x128xf32, #tpu.memory_space<vmem>>, vector<2x128xf32>
    tpu.vector_store %arg7[%c0_13, %c0_14], %6 {strides = array<i32>} : memref<2x128xf32, #tpu.memory_space<vmem>>, vector<2x128xf32>,
    return
  }
  func.func @transform_0(%arg0: i32) -> (i32, i32) {
    %c0_i32 = arith.constant 0 : i32
    %c0_i32_0 = arith.constant 0 : i32
    return %arg0, %c0_i32 : i32, i32
  }
  func.func @transform_1(%arg0: i32) -> (i32, i32) {
    %c0_i32 = arith.constant 0 : i32
    %c0_i32_0 = arith.constant 0 : i32
    %c0_i32_1 = arith.constant 0 : i32
    return %c0_i32, %c0_i32_0 : i32, i32
  }
  func.func @transform_2(%arg0: i32) -> (i32, i32) {
    %c0_i32 = arith.constant 0 : i32
    %c0_i32_0 = arith.constant 0 : i32
    %c0_i32_1 = arith.constant 0 : i32
    return %c0_i32, %c0_i32_0 : i32, i32
  }
  func.func @transform_3(%arg0: i32) -> (i32, i32) {
    %c0_i32 = arith.constant 0 : i32
    %c0_i32_0 = arith.constant 0 : i32
    %c0_i32_1 = arith.constant 0 : i32
    return %c0_i32, %c0_i32_0 : i32, i32
  }
  func.func @transform_4(%arg0: i32) -> (i32, i32) {
    %c0_i32 = arith.constant 0 : i32
    %c0_i32_0 = arith.constant 0 : i32
    return %arg0, %c0_i32 : i32, i32
  }
  func.func @transform_5(%arg0: i32) -> (i32, i32) {
    %c0_i32 = arith.constant 0 : i32
    %c0_i32_0 = arith.constant 0 : i32
    return %arg0, %c0_i32 : i32, i32
  }
  func.func @transform_6(%arg0: i32) -> (i32, i32) {
    %c0_i32 = arith.constant 0 : i32
    %c0_i32_0 = arith.constant 0 : i32
    return %c0_i32, %arg0 : i32, i32
  }
}

</mosaic_0001>

<bundles_post_ra>
// kernel: tpu_custom_call.1
= control target key start
LH: loop header
LB: loop body
LE: loop exit
PB: predicated region body
PF: predicated region fallthrough
CT: control target
= control target key end

     0   :  { %12 = vsyncpa [#allocation3], 0  ;;  %vm105_vm0 = vcmask 1043456   ;;  %vm80_vm1 = vcmask 64512   ;;  %s886_s0 = inlined_call_operand.vmem [shape: bf16[128,8], index: 0, kind: input, shape index: {}]   ;;  %s887_s1 = inlined_call_operand.vmem [shape: bf16[8,128], index: 1, kind: input, shape index: {}]   ;;  %s888_s2 = inlined_call_operand.vmem [shape: f32[128,2], index: 2, kind: input, shape index: {}]   ;;  %s889_s3 = inlined_call_operand.vmem [shape: f32[128,2], index: 3, kind: input, shape index: {}]   ;;  %s890_s4 = inlined_call_operand.hbm [shape: bf16[128,128], index: 4, kind: output, shape index: {0}]   ;;  %s891_s5 = inlined_call_operand.vmem [shape: f32[128,2], index: 5, kind: output, shape index: {1}]   ;;  %s892_s6 = inlined_call_operand.hbm [shape: f32[2,128], index: 6, kind: output, shape index: {2}]  }
   0x1   :  { %v39_v0 = vld [vmem:[%s887_s1] sm:$0xf] }
   0x2   :  { %v107_v1 = vsel %vm105_vm0, %v39_v0, 0  ;;  %v435_v2 = vld [vmem:[%s886_s0] sm:$0xff] }
   0x3   :  { %v439_v3 = vld [vmem:[%s886_s0 + $0x20] sm:$0xff]  ;;  %116 = vmatpush.bf16.msra.mxu0 %v107_v1  ;;  %490 = vmatpush.bf16.msra.mxu2 %v107_v1 }
   0x4   :  { %13 = vsyncpa [#allocation5], 0  ;;  %v436_v4 = vld [vmem:[%s886_s0 + $0x8] sm:$0xff]  ;;  %v173_v6 = vld [vmem:[%s889_s3 + $0x78] sm:$0xff]  ;;  %vm339_vm2 = vcmask 15360   ;;  %s600_s25 = smov [#allocation2]  }
   0x5   :  { %v440_v5 = vld [vmem:[%s886_s0 + $0x28] sm:$0xff]  ;;  %v172_v7 = vld [vmem:[%s889_s3 + $0x70] sm:$0xff]  ;;  %492 = vmatpush.msra.mxu3 %v173_v6  ;;  %491 = vmatpush.msra.mxu1 %v173_v6  ;;  %v170_v9 = vld [vmem:[%s889_s3 + $0x60] sm:$0xff]  ;;  %s361_s26 = sshll.u32 %s600_s25, 4  ;;  %s363_s28 = sshll.u32 %s890_s4, 4  ;;  %s362_s26 = int_to_ptr.vmem [resolvable:$true] %s361_s26  ;;  %s364_s28 = int_to_ptr.hbm [resolvable:$true] %s363_s28 }
   0x6   :  { %427 = vmatmul.msk.bf16.vlgmr.msra.gmra.mxu0 %vm80_vm1, %v435_v2  ;;  %431 = vmatmul.msk.bf16.vlgmr.msra.gmra.mxu2 %vm80_vm1, %v439_v3  ;;  %v171_v8 = vld [vmem:[%s889_s3 + $0x68] sm:$0xff]  ;;  %v169_v10 = vld [vmem:[%s889_s3 + $0x58] sm:$0xff]  ;;  %v168_v11 = vld [vmem:[%s889_s3 + $0x50] sm:$0xff]  ;;  %s601_s29 = smov 64   ;;  %s602_s30 = smov 4  }
   0x7   :  { %174 = vmatpush.msrb.mxu0 %v173_v6  ;;  %494 = vmatpush.msra.mxu3 %v172_v7  ;;  %v167_v12 = vld [vmem:[%s889_s3 + $0x48] sm:$0xff]  ;;  %v437_v13 = vld [vmem:[%s886_s0 + $0x10] sm:$0xff]  ;;  %v166_v15 = vld [vmem:[%s889_s3 + $0x40] sm:$0xff]  ;;  %s603_s8 = smov [#allocation4]  }
   0x8   :  { %493 = vmatpush.msra.mxu1 %v172_v7  ;;  %v441_v14 = vld [vmem:[%s886_s0 + $0x30] sm:$0xff]  ;;  %v438_v16 = vld [vmem:[%s886_s0 + $0x18] sm:$0xff]  ;;  %v163_v20 = vld [vmem:[%s889_s3 + $0x28] sm:$0xff]  ;;  %s377_s9 = sshll.u32 %s603_s8, 4  ;;  %s378_s9 = int_to_ptr.vmem [resolvable:$true] %s377_s9 }
   0x9   :  { %175 = vmatpush.msrb.mxu0 %v172_v7  ;;  %496 = vmatpush.msra.mxu3 %v171_v8  ;;  %v442_v17 = vld [vmem:[%s886_s0 + $0x38] sm:$0xff]  ;;  %v164_v19 = vld [vmem:[%s889_s3 + $0x30] sm:$0xff]  ;;  %v162_v21 = vld [vmem:[%s889_s3 + $0x20] sm:$0xff]  ;;  %s379_s0 = sshll.u32 %s892_s6, 4  ;;  %s380_s0 = int_to_ptr.hbm [resolvable:$true] %s379_s0 }
   0xa   :  { %495 = vmatpush.msra.mxu1 %v171_v8  ;;  %v165_v18 = vld [vmem:[%s889_s3 + $0x38] sm:$0xff]  ;;  %v160_v23 = vld [vmem:[%s889_s3 + $0x10] sm:$0xff]  ;;  %v159_v24 = vld [vmem:[%s889_s3 + $0x8] sm:$0xff] }
   0xb   :  { %176 = vmatpush.msrb.mxu0 %v171_v8  ;;  %498 = vmatpush.msra.mxu3 %v170_v9  ;;  %v161_v22 = vld [vmem:[%s889_s3 + $0x18] sm:$0xff]  ;;  %v158_v25 = vld [vmem:[%s889_s3] sm:$0xff]  ;;  %v253_v39 = vld [vmem:[%s888_s2 + $0x70] sm:$0xff] }
   0xc   :  { %497 = vmatpush.msra.mxu1 %v170_v9  ;;  %v254_v36 = vld [vmem:[%s888_s2 + $0x78] sm:$0xff]  ;;  %v252_v41 = vld [vmem:[%s888_s2 + $0x68] sm:$0xff]  ;;  %v251_v42 = vld [vmem:[%s888_s2 + $0x60] sm:$0xff] }
   0xd   :  { %177 = vmatpush.msrb.mxu0 %v170_v9  ;;  %500 = vmatpush.msra.mxu3 %v169_v10  ;;  %v250_v43 = vld [vmem:[%s888_s2 + $0x58] sm:$0xff]  ;;  %v249_v45 = vld [vmem:[%s888_s2 + $0x50] sm:$0xff]  ;;  %v248_v48 = vld [vmem:[%s888_s2 + $0x48] sm:$0xff] }
   0xe   :  { %499 = vmatpush.msra.mxu1 %v169_v10  ;;  %526 = vmatpush.lsf.msrb.mxu2 %v254_v36  ;;  %v247_v49 = vld [vmem:[%s888_s2 + $0x40] sm:$0xff]  ;;  %v246_v50 = vld [vmem:[%s888_s2 + $0x38] sm:$0xff]  ;;  %v245_v53 = vld [vmem:[%s888_s2 + $0x30] sm:$0xff] }
   0xf   :  { %178 = vmatpush.msrb.mxu0 %v169_v10  ;;  %502 = vmatpush.msra.mxu3 %v168_v11  ;;  %v244_v55 = vld [vmem:[%s888_s2 + $0x28] sm:$0xff]  ;;  %v243_v56 = vld [vmem:[%s888_s2 + $0x20] sm:$0xff]  ;;  %v242_v57 = vld [vmem:[%s888_s2 + $0x18] sm:$0xff] }
  0x10   :  { %501 = vmatpush.msra.mxu1 %v168_v11  ;;  %527 = vmatpush.lsf.msrb.mxu2 %v253_v39  ;;  %v241_v59 = vld [vmem:[%s888_s2 + $0x10] sm:$0xff]  ;;  %v240_v62 = vld [vmem:[%s888_s2 + $0x8] sm:$0xff]  ;;  %v239_v63 = vld [vmem:[%s888_s2] sm:$0xff] }
  0x11   :  { %179 = vmatpush.msrb.mxu0 %v168_v11  ;;  %504 = vmatpush.msra.mxu3 %v167_v12 }
  0x12   :  { %503 = vmatpush.msra.mxu1 %v167_v12  ;;  %528 = vmatpush.lsf.msrb.mxu2 %v252_v41 }
  0x13   :  { %180 = vmatpush.msrb.mxu0 %v167_v12  ;;  %506 = vmatpush.msra.mxu3 %v166_v15 }
  0x14   :  { %505 = vmatpush.msra.mxu1 %v166_v15  ;;  %529 = vmatpush.lsf.msrb.mxu2 %v251_v42 }
  0x15   :  { %181 = vmatpush.msrb.mxu0 %v166_v15  ;;  %508 = vmatpush.msra.mxu3 %v165_v18 }
  0x16   :  { %428 = vmatmul.msk.bf16.gmra.mxu0 %vm80_vm1, %v436_v4  ;;  %432 = vmatmul.msk.bf16.gmra.mxu2 %vm80_vm1, %v440_v5 }
  0x17   :  { %507 = vmatpush.msra.mxu1 %v165_v18  ;;  %182 = vmatpush.msrb.mxu0 %v165_v18 }
  0x18   :  { %510 = vmatpush.msra.mxu3 %v164_v19  ;;  %530 = vmatpush.lsf.msrb.mxu2 %v250_v43 }
  0x19   :  { %509 = vmatpush.msra.mxu1 %v164_v19  ;;  %183 = vmatpush.msrb.mxu0 %v164_v19 }
  0x1a   :  { %512 = vmatpush.msra.mxu3 %v163_v20  ;;  %531 = vmatpush.lsf.msrb.mxu2 %v249_v45 }
  0x1b   :  { %511 = vmatpush.msra.mxu1 %v163_v20  ;;  %184 = vmatpush.msrb.mxu0 %v163_v20 }
  0x1c   :  { %514 = vmatpush.msra.mxu3 %v162_v21  ;;  %532 = vmatpush.lsf.msrb.mxu2 %v248_v48 }
  0x1d   :  { %513 = vmatpush.msra.mxu1 %v162_v21  ;;  %185 = vmatpush.msrb.mxu0 %v162_v21 }
  0x1e   :  { %516 = vmatpush.msra.mxu3 %v161_v22  ;;  %533 = vmatpush.lsf.msrb.mxu2 %v247_v49 }
  0x1f   :  { %515 = vmatpush.msra.mxu1 %v161_v22  ;;  %186 = vmatpush.msrb.mxu0 %v161_v22 }
  0x20   :  { %518 = vmatpush.msra.mxu3 %v160_v23  ;;  %534 = vmatpush.lsf.msrb.mxu2 %v246_v50 }
  0x21   :  { %517 = vmatpush.msra.mxu1 %v160_v23  ;;  %187 = vmatpush.msrb.mxu0 %v160_v23 }
  0x22   :  { %520 = vmatpush.msra.mxu3 %v159_v24  ;;  %535 = vmatpush.lsf.msrb.mxu2 %v245_v53 }
  0x23   :  { %519 = vmatpush.msra.mxu1 %v159_v24  ;;  %188 = vmatpush.msrb.mxu0 %v159_v24 }
  0x24   :  { %522 = vmatpush.msra.mxu3 %v158_v25  ;;  %536 = vmatpush.lsf.msrb.mxu2 %v244_v55 }
  0x25   :  { %521 = vmatpush.msra.mxu1 %v158_v25  ;;  %189 = vmatpush.msrb.mxu0 %v158_v25 }
  0x26   :  { %429 = vmatmul.msk.bf16.gmra.mxu0 %vm80_vm1, %v437_v13  ;;  %433 = vmatmul.msk.bf16.gmra.mxu2 %vm80_vm1, %v441_v14 }
  0x27   :  { %537 = vmatpush.lsf.msrb.mxu2 %v243_v56 }
  0x29   :  { %538 = vmatpush.lsf.msrb.mxu2 %v242_v57 }
  0x2b   :  { %539 = vmatpush.lsf.msrb.mxu2 %v241_v59 }
  0x2d   :  { %540 = vmatpush.lsf.msrb.mxu2 %v240_v62 }
  0x2f   :  { %541 = vmatpush.lsf.msrb.mxu2 %v239_v63 }
  0x36   :  { %430 = vmatmul.msk.bf16.gmra.mxu0 %vm80_vm1, %v438_v16  ;;  %434 = vmatmul.msk.bf16.gmra.mxu2 %vm80_vm1, %v442_v17 }
  0x45   :  { %542 = vllmr.1.mxu2 }
  0x83   :  { %v723_v26 = vpop.f32.mrf.mxu0 }
  0x84   :  { %190 = vmatmul.f32.vlgmr.msrb.gmra.mxu0 %v723_v26 }
  0x89   :  { %v726_v27 = vpop.f32.mrf.mxu2 }
  0x8b   :  { %v728_v28 = vpop.f32.mrf.mxu0 }
  0x8c   :  { %v446_v29 = vpack.c.bf16 %v728_v28, %v723_v26  ;;  %193 = vmatmul.f32.gmra.mxu0 %v728_v28 }
  0x8e   :  { %447 = vst [vmem:[#allocation2] sm:$0xff] %v446_v29  }
  0x91   :  { %v733_v30 = vpop.f32.mrf.mxu2 }
  0x92   :  { %v466_v31 = vpack.c.bf16 %v733_v30, %v726_v27  ;;  %217 = vmatmul.f32.vlgmr.msra.gmra.mxu3 %v733_v30 }
  0x93   :  { %v738_v32 = vpop.f32.mrf.mxu0 }
  0x94   :  { %486 = vst [vmem:[#allocation2 + $0x20] sm:$0xff] %v466_v31   ;;  %196 = vmatmul.f32.vlgmr.msra.gmra.mxu1 %v738_v32 }
  0x99   :  { %v741_v33 = vpop.f32.mrf.mxu2 }
  0x9a   :  { %220 = vmatmul.f32.gmra.mxu3 %v741_v33 }
  0x9b   :  { %v744_v34 = vpop.f32.mrf.mxu0 }
  0x9c   :  { %v451_v35 = vpack.c.bf16 %v744_v34, %v738_v32  ;;  %199 = vmatmul.f32.gmra.mxu1 %v744_v34 }
  0x9e   :  { %483 = vst [vmem:[#allocation2 + $0x8] sm:$0xff] %v451_v35  }
  0xa1   :  { %v752_v37 = vpop.f32.mrf.mxu2 }
  0xa2   :  { %v471_v38 = vpack.c.bf16 %v752_v37, %v741_v33  ;;  %223 = vmatmul.f32.gmra.mxu3 %v752_v37 }
  0xa3   :  { %v760_v40 = vpop.f32.mrf.mxu0 }
  0xa4   :  { %487 = vst [vmem:[#allocation2 + $0x28] sm:$0xff] %v471_v38   ;;  %202 = vmatmul.f32.gmra.mxu1 %v760_v40 }
  0xa9   :  { %v148_v44 = vpop.f32.mrf.mxu2 }
  0xaa   :  { %226 = vmatmul.f32.gmra.mxu3 %v148_v44 }
  0xab   :  { %v130_v46 = vpop.f32.mrf.mxu0 }
  0xac   :  { %v456_v47 = vpack.c.bf16 %v130_v46, %v760_v40  ;;  %205 = vmatmul.f32.gmra.mxu1 %v130_v46 }
  0xae   :  { %484 = vst [vmem:[#allocation2 + $0x10] sm:$0xff] %v456_v47  }
  0xb1   :  { %v150_v51 = vpop.f32.mrf.mxu2 }
  0xb2   :  { %v476_v52 = vpack.c.bf16 %v150_v51, %v148_v44  ;;  %229 = vmatmul.f32.gmra.mxu3 %v150_v51 }
  0xb3   :  { %v133_v54 = vpop.f32.mrf.mxu0 }
  0xb4   :  { %488 = vst [vmem:[#allocation2 + $0x30] sm:$0xff] %v476_v52   ;;  %208 = vmatmul.f32.gmra.mxu1 %v133_v54 }
  0xb9   :  { %v153_v58 = vpop.f32.mrf.mxu2 }
  0xba   :  { %232 = vmatmul.f32.gmra.mxu3 %v153_v58 }
  0xbb   :  { %v135_v60 = vpop.f32.mrf.mxu0 }
  0xbc   :  { %v461_v61 = vpack.c.bf16 %v135_v60, %v133_v54  ;;  %211 = vmatmul.f32.gmra.mxu1 %v135_v60 }
  0xbe   :  { %485 = vst [vmem:[#allocation2 + $0x18] sm:$0xff] %v461_v61  }
  0xc1   :  { %v155_v0 = vpop.f32.mrf.mxu2 }
  0xc2   :  { %v481_v1 = vpack.c.bf16 %v155_v0, %v153_v58  ;;  %235 = vmatmul.f32.gmra.mxu3 %v155_v0  ;;  %287 = vmatpush.xpose.msra.mxu2 %v155_v0 }
  0xc4   :  { %489 = vst [vmem:[#allocation2 + $0x38] sm:$0xff] %v481_v1   ;;  %214 = vmatmul.f32.gmra.mxu1 %v726_v27 }
  0xc5   :  { %369 = dma.vmem_to_hbm [thread:$0]  %s362_s26, 1024, %s364_s28, [#allocation3], %s601_s29, %s601_s29, %s602_s30  }
  0xc6   :  { %288 = vmatpush.xpose.msra.mxu2 %v153_v58 }
  0xca   :  { %289 = vmatpush.xpose.msra.mxu2 %v150_v51 }
  0xce   :  { %290 = vmatpush.xpose.msra.mxu2 %v148_v44 }
  0xd2   :  { %291 = vmatpush.xpose.msra.mxu2 %v752_v37 }
  0xd6   :  { %292 = vmatpush.xpose.msra.mxu2 %v741_v33 }
  0xda   :  { %293 = vmatpush.xpose.msra.mxu2 %v733_v30 }
  0xde   :  { %294 = vmatpush.xpose.msra.mxu2 %v726_v27 }
  0xe2   :  { %295 = vmatpush.xpose.msra.mxu2 %v135_v60 }
  0xe6   :  { %296 = vmatpush.xpose.msra.mxu2 %v133_v54 }
  0xea   :  { %297 = vmatpush.xpose.msra.mxu2 %v130_v46 }
  0xee   :  { %298 = vmatpush.xpose.msra.mxu2 %v760_v40 }
  0xf2   :  { %299 = vmatpush.xpose.msra.mxu2 %v744_v34 }
  0xf6   :  { %300 = vmatpush.xpose.msra.mxu2 %v738_v32 }
  0xfa   :  { %301 = vmatpush.xpose.msra.mxu2 %v728_v28 }
  0xfe   :  { %302 = vmatpush.xpose.msra.mxu2 %v723_v26 }
 0x101   :  { %543 = vmatmul.lmr.bf16.vlgmr.msra.gmra.1.mxu2  ;;  %v191_v2 = vpop.f32.mrf.mxu0 }
 0x102   :  { %340 = vst.msk [vmem:[%s891_s5] sm:$0xff] %vm339_vm2, %v191_v2 }
 0x109   :  { %v194_v3 = vpop.f32.mrf.mxu0 }
 0x10a   :  { %341 = vst.msk [vmem:[%s891_s5 + $0x8] sm:$0xff] %vm339_vm2, %v194_v3 }
 0x111   :  { %v197_v4 = vpop.f32.mrf.mxu1 }
 0x112   :  { %342 = vst.msk [vmem:[%s891_s5 + $0x10] sm:$0xff] %vm339_vm2, %v197_v4 }
 0x115   :  { %v218_v5 = vpop.f32.mrf.mxu3 }
 0x116   :  { %349 = vst.msk [vmem:[%s891_s5 + $0x48] sm:$0xff] %vm339_vm2, %v218_v5 }
 0x119   :  { %v200_v6 = vpop.f32.mrf.mxu1 }
 0x11a   :  { %343 = vst.msk [vmem:[%s891_s5 + $0x18] sm:$0xff] %vm339_vm2, %v200_v6 }
 0x11d   :  { %v221_v7 = vpop.f32.mrf.mxu3 }
 0x11e   :  { %350 = vst.msk [vmem:[%s891_s5 + $0x50] sm:$0xff] %vm339_vm2, %v221_v7 }
 0x121   :  { %v203_v8 = vpop.f32.mrf.mxu1 }
 0x122   :  { %344 = vst.msk [vmem:[%s891_s5 + $0x20] sm:$0xff] %vm339_vm2, %v203_v8 }
 0x125   :  { %v224_v9 = vpop.f32.mrf.mxu3 }
 0x126   :  { %351 = vst.msk [vmem:[%s891_s5 + $0x58] sm:$0xff] %vm339_vm2, %v224_v9 }
 0x129   :  { %v206_v10 = vpop.f32.mrf.mxu1 }
 0x12a   :  { %345 = vst.msk [vmem:[%s891_s5 + $0x28] sm:$0xff] %vm339_vm2, %v206_v10 }
 0x12d   :  { %v227_v11 = vpop.f32.mrf.mxu3 }
 0x12e   :  { %352 = vst.msk [vmem:[%s891_s5 + $0x60] sm:$0xff] %vm339_vm2, %v227_v11 }
 0x131   :  { %v209_v12 = vpop.f32.mrf.mxu1 }
 0x132   :  { %346 = vst.msk [vmem:[%s891_s5 + $0x30] sm:$0xff] %vm339_vm2, %v209_v12 }
 0x135   :  { %v230_v13 = vpop.f32.mrf.mxu3 }
 0x136   :  { %353 = vst.msk [vmem:[%s891_s5 + $0x68] sm:$0xff] %vm339_vm2, %v230_v13 }
 0x139   :  { %v212_v14 = vpop.f32.mrf.mxu1 }
 0x13a   :  { %347 = vst.msk [vmem:[%s891_s5 + $0x38] sm:$0xff] %vm339_vm2, %v212_v14 }
 0x13d   :  { %v233_v15 = vpop.f32.mrf.mxu3 }
 0x13e   :  { %354 = vst.msk [vmem:[%s891_s5 + $0x70] sm:$0xff] %vm339_vm2, %v233_v15 }
 0x141   :  { %v215_v16 = vpop.f32.mrf.mxu1 }
 0x142   :  { %348 = vst.msk [vmem:[%s891_s5 + $0x40] sm:$0xff] %vm339_vm2, %v215_v16 }
 0x145   :  { %v236_v17 = vpop.f32.mrf.mxu3 }
 0x146   :  { %355 = vst.msk [vmem:[%s891_s5 + $0x78] sm:$0xff] %vm339_vm2, %v236_v17 }
 0x184   :  { %v304_v18 = vpop.f32.mrf.mxu2 }
 0x185   :  { %356 = vst [vmem:[#allocation4] sm:$0x3] %v304_v18 }
 0x186   :  { %382 = dma.vmem_to_hbm [thread:$0]  %s378_s9, 32, %s380_s0, [#allocation5]  }
 0x187   :  { %596 = dma.done.wait [#allocation3], 1024  }
 0x188   :  { %597 = vsyncadd [#allocation3], 4294966272 }
 0x189   :  { %598 = dma.done.wait [#allocation5], 32  }
 0x18a   :  { %599 = vsyncadd [#allocation5], 4294967264 }
 0x18b   :  { %393 = vsyncpa [#allocation3], 1 }
 0x18c   :  { %394 = vsyncpa [#allocation5], 1 }

</bundles_post_ra>
